<compile_context>
chip_gen: v7x
topology: tpu7x:2x2x1
jax: 0.10.0
libtpu: 0.0.40
codegen_flags: <defaults>
</compile_context>

<pallas_src>
import functools

import jax
import jax.numpy as jnp
from jax.experimental import pallas as pl
from jax.experimental.pallas import tpu as pltpu

NUM_EXPERTS = 2
TOP_K = 2                      # == NUM_EXPERTS -> dense softmax gating
LORA_R = 8
LORA_ALPHA = 16
SCALE = LORA_ALPHA / LORA_R
LANE = 128


def _round_up(x, m):
    return (x + m - 1) // m * m


def _pick_tile(n_tokens, token_tile):
    """Big tiles amortize the ~0.35us/step overhead, but keep >=2 grid steps
    (v7x megacore) whenever there are at least two sublane-groups of tokens."""
    if n_tokens >= 2 * 8:
        cap = _round_up((n_tokens + 1) // 2, 8)
    else:
        cap = _round_up(max(n_tokens, 1), 8)
    return max(8, min(_round_up(token_tile, 8), cap))


def auto_adapter_kernel(x_ref, tw_ref, w_ref, bd_ref, o_ref, *, d_out):
    # bf16 MXU path: weights arrive pre-cast; cast x on the VPU (has slack), accumulate f32.
    x = x_ref[...].astype(jnp.bfloat16)                # (T, D_in)
    tw = tw_ref[...]                                   # (T, 1) f32

    # One lane-dense MXU push per 8-row group. Fused weight columns:
    #   [ scale*A0@B0 (d_out) | scale*A1@B1 (d_out) | wr[:,0]-wr[:,1] (1) | zero pad ]
    fused = jnp.dot(x, w_ref[...], preferred_element_type=jnp.float32)  # (T, 128) f32

    y0 = fused[:, :d_out]                              # expert 0 output (lanes 0..31)
    y1 = fused[:, d_out:2 * d_out]                     # expert 1 output (one XLU lane-rotate)
    d = fused[:, 2 * d_out:2 * d_out + 1] + bd_ref[0, 0]   # router logit diff + bias diff

    # softmax over 2 experts == sigmoid of the logit difference (exact for top_k == E == 2).
    g0 = jax.nn.sigmoid(d)                             # (T, 1)
    w0 = tw * g0                                       # tw * gate0
    w1 = tw - w0                                       # tw * gate1 == tw * (1 - gate0)

    # type_weight masking is implicit: rows with tw == 0 produce exactly 0 (y finite).
    o_ref[...] = (w0 * y0 + w1 * y1).astype(o_ref.dtype)


def auto_adapter_forward(x, type_weight, wr, br, lora_a, lora_b, *, token_tile=4096):
    """x: (B, S, D_in) float, type_weight: (B, S) float -> (B, S, D_out) of x.dtype."""
    B, S, D_in = x.shape
    D_out = lora_b.shape[-1]
    N = B * S

    # ---- fuse all weights once (tiny, resident in VMEM; shipped in bf16) ----
    ab = jnp.einsum('eir,ero->eio', lora_a, lora_b) * SCALE             # (E, D_in, D_out)
    logit_diff_w = (wr[:, 0] - wr[:, 1])[:, None]                       # (D_in, 1)
    w_cat = jnp.concatenate([ab[0], ab[1], logit_diff_w], axis=-1)      # (D_in, 2*D_out+1)
    n_cols = _round_up(2 * D_out + 1, LANE)
    w_cat = jnp.pad(w_cat, ((0, 0), (0, n_cols - (2 * D_out + 1))))
    w_cat = w_cat.astype(jnp.bfloat16)                                  # (D_in, n_cols) bf16
    bias_diff = jnp.reshape(br[0, 0] - br[0, 1], (1, 1)).astype(jnp.float32)  # SMEM scalar

    # ---- no activation pad / output slice: metadata reshapes only ----
    xf = x.reshape(N, D_in)
    twf = type_weight.reshape(N, 1).astype(jnp.float32)

    tile = _pick_tile(N, token_tile)
    grid = (pl.cdiv(N, tile),)   # ragged last tile handled by Pallas partial-block clipping

    out = pl.pallas_call(
        functools.partial(auto_adapter_kernel, d_out=D_out),
        out_shape=jax.ShapeDtypeStruct((N, D_out), x.dtype),
        grid_spec=pltpu.PrefetchScalarGridSpec(
            num_scalar_prefetch=0,
            grid=grid,
            in_specs=[
                pl.BlockSpec((tile, D_in), lambda i: (i, 0)),           # x tile
                pl.BlockSpec((tile, 1), lambda i: (i, 0)),              # type_weight tile
                pl.BlockSpec((D_in, n_cols), lambda i: (0, 0)),         # fused bf16 weight (resident)
                pl.BlockSpec(memory_space=pltpu.MemorySpace.SMEM),      # router bias diff scalar
            ],
            out_specs=pl.BlockSpec((tile, D_out), lambda i: (i, 0)),
        ),
        compiler_params=pltpu.CompilerParams(
            dimension_semantics=("parallel",),   # shards the token grid across TCs on v7x
        ),
    )(xf, twf, w_cat, bias_diff)
    return out.reshape(B, S, D_out)


if __name__ == "__main__":
    key = jax.random.PRNGKey(0)
    B, S, D_in, D_out = 2, 8, 32, 32
    k1, k2, k3, k4, k5 = jax.random.split(key, 5)

    x = jax.random.normal(k1, (B, S, D_in), jnp.float32)
    # per-token scalar gate; zero out some entries so the masked path is exercised
    tw_raw = jax.random.uniform(k2, (B, S), jnp.float32)
    type_weight = jnp.where(tw_raw > 0.5, tw_raw, 0.0)

    # deterministic synthetic parameters (shapes from the module's __init__)
    wr = jax.random.normal(k3, (D_in, NUM_EXPERTS), jnp.float32) * 0.05   # router weight
    br = jnp.zeros((1, NUM_EXPERTS), jnp.float32)                          # router bias
    lora_a = jax.random.normal(k4, (NUM_EXPERTS, D_in, LORA_R), jnp.float32) * 0.05
    lora_b = jax.random.normal(k5, (NUM_EXPERTS, LORA_R, D_out), jnp.float32) * 0.05

    out = auto_adapter_forward(x, type_weight, wr, br, lora_a, lora_b)
    out = jax.block_until_ready(out)

    # pure-JAX f32 reference of the module's forward (per-expert, softmax gating, where-mask)
    def ref(x, tw):
        logits = x @ wr + br
        g = jax.nn.softmax(logits, axis=-1)
        y = jnp.zeros(x.shape[:-1] + (D_out,), jnp.float32)
        for e in range(NUM_EXPERTS):
            y = y + g[..., e:e + 1] * ((x @ lora_a[e]) @ lora_b[e]) * SCALE
        twe = tw[..., None]
        return jnp.where(twe != 0, twe * y, 0.0)

    expected = ref(x, type_weight)
    assert out.shape == (B, S, D_out) and out.dtype == x.dtype
    # bf16 matmul path (f32 accumulate) -> slightly looser tolerance than a pure-f32 check.
    assert jnp.allclose(out, expected, atol=5e-3, rtol=1e-2)
    print("KERNEL_OK")
</pallas_src>

<mosaic_0001>
module attributes {stable_mosaic.version = 11 : i64} {
  func.func @auto_adapter_kernel(%arg0: i32, %arg1: memref<8x32xf32, #tpu.memory_space<vmem>>, %arg2: memref<8x1xf32, #tpu.memory_space<vmem>>, %arg3: memref<32x128xbf16, #tpu.memory_space<vmem>>, %arg4: memref<1x1xf32, #tpu.memory_space<smem>>, %arg5: memref<8x32xf32, #tpu.memory_space<vmem>>) attributes {dimension_semantics = [#tpu.dimension_semantics<parallel>], iteration_bounds = array<i64: 2>, scalar_prefetch = 0 : i64, scratch_operands = 0 : i64, tpu.core_type = #tpu.core_type<tc>, window_params = [{transform_indices = @transform_0, window_bounds = array<i64: 8, 32>}, {transform_indices = @transform_1, window_bounds = array<i64: 8, 1>}, {pipeline_mode = #tpu.pipeline_mode<synchronous>, transform_indices = @transform_2, window_bounds = array<i64: 32, 128>}, {transform_indices = @transform_3, window_bounds = array<i64: 1, 1>}, {transform_indices = @transform_4, window_bounds = array<i64: 8, 32>}]} {
    %c0 = arith.constant 0 : index
    %c0_0 = arith.constant 0 : index
    %0 = vector.load %arg1[%c0, %c0_0] : memref<8x32xf32, #tpu.memory_space<vmem>>, vector<8x32xf32>
    %1 = arith.truncf %0 : vector<8x32xf32> to vector<8x32xbf16>
    %c0_1 = arith.constant 0 : index
    %c0_2 = arith.constant 0 : index
    %2 = vector.load %arg2[%c0_1, %c0_2] : memref<8x1xf32, #tpu.memory_space<vmem>>, vector<8x1xf32>
    %c0_3 = arith.constant 0 : index
    %c0_4 = arith.constant 0 : index
    %3 = vector.load %arg3[%c0_3, %c0_4] : memref<32x128xbf16, #tpu.memory_space<vmem>>, vector<32x128xbf16>
    %cst = arith.constant dense<0.000000e+00> : vector<8x128xf32>
    %4 = tpu.matmul %1, %3, %cst {dimension_numbers = #tpu.dot_dimension_numbers<[1], [0], [0], [1], [0, 0, 1, 1], [], []>} : vector<8x32xbf16>, vector<32x128xbf16>, vector<8x128xf32> -> vector<8x128xf32>
    %5 = vector.extract_strided_slice %4 {offsets = [0, 0], sizes = [8, 32], strides = [1, 1]} : vector<8x128xf32> to vector<8x32xf32>
    %6 = vector.extract_strided_slice %4 {offsets = [0, 32], sizes = [8, 32], strides = [1, 1]} : vector<8x128xf32> to vector<8x32xf32>
    %7 = vector.extract_strided_slice %4 {offsets = [0, 64], sizes = [8, 1], strides = [1, 1]} : vector<8x128xf32> to vector<8x1xf32>
    %c0_5 = arith.constant 0 : index
    %c0_6 = arith.constant 0 : index
    %8 = memref.load %arg4[%c0_5, %c0_6] : memref<1x1xf32, #tpu.memory_space<smem>>
    %9 = vector.broadcast %8 : f32 to vector<8x1xf32>
    %10 = arith.addf %7, %9 : vector<8x1xf32>
    %11 = arith.negf %10 : vector<8x1xf32>
    %12 = math.exp %11 : vector<8x1xf32>
    %cst_7 = arith.constant 1.000000e+00 : f32
    %13 = vector.broadcast %cst_7 : f32 to vector<8x1xf32>
    %14 = arith.addf %13, %12 : vector<8x1xf32>
    %15 = arith.divf %13, %14 : vector<8x1xf32>
    %16 = arith.mulf %2, %15 : vector<8x1xf32>
    %17 = arith.subf %2, %16 : vector<8x1xf32>
    %18 = vector.broadcast %16 : vector<8x1xf32> to vector<8x32xf32>
    %19 = arith.mulf %18, %5 : vector<8x32xf32>
    %20 = vector.broadcast %17 : vector<8x1xf32> to vector<8x32xf32>
    %21 = arith.mulf %20, %6 : vector<8x32xf32>
    %22 = arith.addf %19, %21 : vector<8x32xf32>
    %c0_8 = arith.constant 0 : index
    %c0_9 = arith.constant 0 : index
    %23 = vector.load %arg5[%c0_8, %c0_9] : memref<8x32xf32, #tpu.memory_space<vmem>>, vector<8x32xf32>
    tpu.vector_store %arg5[%c0_8, %c0_9], %22 {strides = array<i32>} : memref<8x32xf32, #tpu.memory_space<vmem>>, vector<8x32xf32>,
    return
  }
  func.func @transform_0(%arg0: i32) -> (i32, i32) {
    %c0_i32 = arith.constant 0 : i32
    %c0_i32_0 = arith.constant 0 : i32
    return %arg0, %c0_i32 : i32, i32
  }
  func.func @transform_1(%arg0: i32) -> (i32, i32) {
    %c0_i32 = arith.constant 0 : i32
    %c0_i32_0 = arith.constant 0 : i32
    return %arg0, %c0_i32 : i32, i32
  }
  func.func @transform_2(%arg0: i32) -> (i32, i32) {
    %c0_i32 = arith.constant 0 : i32
    %c0_i32_0 = arith.constant 0 : i32
    %c0_i32_1 = arith.constant 0 : i32
    return %c0_i32, %c0_i32_0 : i32, i32
  }
  func.func @transform_3(%arg0: i32) -> (i32, i32) {
    %c0_i32 = arith.constant 0 : i32
    %c0_i32_0 = arith.constant 0 : i32
    %c0_i32_1 = arith.constant 0 : i32
    return %c0_i32, %c0_i32_0 : i32, i32
  }
  func.func @transform_4(%arg0: i32) -> (i32, i32) {
    %c0_i32 = arith.constant 0 : i32
    %c0_i32_0 = arith.constant 0 : i32
    return %arg0, %c0_i32 : i32, i32
  }
}

</mosaic_0001>

<bundles_post_ra>
// kernel: tpu_custom_call.1
= control target key start
LH: loop header
LB: loop body
LE: loop exit
PB: predicated region body
PF: predicated region fallthrough
CT: control target
= control target key end

     0   :  { %s793_s0 = inlined_call_operand.vmem [shape: f32[16,32], index: 0, kind: input, shape index: {}]   ;;  %s794_s1 = inlined_call_operand.vmem [shape: f32[16,1], index: 1, kind: input, shape index: {}]   ;;  %s795_s2 = inlined_call_operand.hbm [shape: bf16[32,128], index: 2, kind: input, shape index: {}]   ;;  %s796_s3 = inlined_call_operand.<no memory space> [shape: f32[1,1], index: 3, kind: input, shape index: {}]   ;;  %s797_s4 = inlined_call_operand.hbm [shape: f32[16,32], index: 4, kind: output, shape index: {}]  }
   0x1   :  { %9 = sst [smem:[#allocation2]] %s796_s3 }
   0x2   :  { %10 = vsyncpa [#allocation4], 0 }
   0x3   :  { %11 = vsyncpa [#allocation5], 0 }
   0x4   :  { %13 = vsyncpa [#allocation5 + $0x1], 0  ;;  %s646_s17 = smov 0   ;;  %s648_s18 = smov 0  }
   0x5   :  { %s650_s19 = smov 0   ;;  %s652_s20 = smov 0  }
   0x6 LB: > { %s667_s3 = sadd.s32 4294967295, %s607_s20   ;;  %s420_s21 = sadd.s32 4294967294, %s607_s20   ;;  %s607_s20 = sphi %s652_s20, %s813_s20   ;;  %s603_s19 = sphi %s650_s19, %s812_s19   ;;  %s599_s18 = sphi %s648_s18, %s811_s18   ;;  %s595_s17 = sphi %s646_s17, %s810_s17  }
   0x7   : > { %s671_s22 = sadd.s32 1, %s607_s20   ;;  %s120_s23 = sadd.s32 1, %s603_s19 }
   0x8   : > { %s117_s24 = ssub.s32 %s607_s20, %s671_s22  ;;  %p130_p0 = scmp.ne.s32.totalorder %s603_s19, %s599_s18 }
   0x9   : > { %p118_p1 = scmp.eq.s32.totalorder %s117_s24, 0  ;;  %p131_p2 = scmp.eq.s32.totalorder %s667_s3, 1 }
   0xa   : > { %p136_p3 = scmp.ne.s32.totalorder %s599_s18, %s595_s17  ;;  %p137_p4 = scmp.eq.s32.totalorder %s420_s21, 1 }
   0xb   : > { %s682_s25 = scalar_select %p118_p1, %s603_s19, %s120_s23  }
   0xc   : > { %p684_p5 = por %p131_p2, %p130_p0  ;;  %p688_p6 = por %p137_p4, %p136_p3 }
   0xd   : > { %p421_p7 = scmp.ge.s32.totalorder %s607_s20, 1  ;;  %p144_p8 = scmp.lt.s32.totalorder %s607_s20, 3 }
   0xe   : > { %s801_s26 = scalar_select %p684_p5, 1, 0 }
   0xf   : > { %s802_s27 = scalar_select %p688_p6, 1, 0 }
  0x10   : > { %p798_p9 = scmp.eq.s32.totalorder %s667_s3, 0  ;;  %p695_p10 = pnand %p421_p7, %p144_p8 }
  0x11   : > { %s609_s29 = smov [#allocation3]   ;;  %s513_s8 = scalar_lea.hbm %s795_s2, 256 }
  0x12   : > { %s803_s28 = scalar_select %p695_p10, 1, 0 }
  0x13   : > { %s156_s30 = sshll.u32 %s609_s29, 4  ;;  %p454_p11 = pneg %p695_p10  ;;  %s157_s30 = int_to_ptr.vmem [resolvable:$true] %s156_s30 }
  0x14   : > { %p514_p13 = scmp.ne.s32.totalorder %s795_s2, %s513_s8  ;;  %p520_p3 = scmp.lt.u32.totalorder %s513_s8, %s795_s2 }
  0x15   : > { %p703_p12 = pnand %p798_p9, %p454_p11 }
  0x17   : > { %p515_p0 = pneg %p703_p12 }
  0x19   : > { %p516_p1 = pnand %p515_p0, %p514_p13 }
  0x1b   : > { %p517_p2 = pneg %p516_p1 }
  0x1d   : > { %p522_p4 = pnand %p520_p3, %p517_p2 }
  0x1f   : > { %525 = shalt.err (!%p522_p4)
}
  0x20   : > { %s526_s13 = scalar_lea.vmem %s157_s30, 256  ;;  %p534_p9 = scmp.lt.s32.totalorder %s157_s30, %s157_s30 }
  0x21   : > { %p527_p7 = scmp.ne.s32.totalorder %s157_s30, %s526_s13  ;;  %p535_p6 = scmp.lt.s32.totalorder %s526_s13, %s526_s13 }
  0x23   : > { %p529_p8 = pnand %p527_p7, %p515_p0  ;;  %p536_p5 = por %p535_p6, %p534_p9 }
  0x25   : > { %p530_p11 = pneg %p529_p8 }
  0x27   : > { %p537_p10 = pnand %p536_p5, %p530_p11 }
  0x29   : > { %540 = shalt.err (!%p537_p10)
}
  0x2a   : > { %s610_s14 = smov 64   ;;  %s611_s15 = smov 4  }
  0x2b   : > { %457 = dma.hbm_to_vmem [thread:$0]  (!%p703_p12), %s795_s2, 256, %s157_s30, [#allocation4], %s610_s14, %s610_s14, %s611_s15  }
  0x2c   : > { %p805_p13 = scmp.ne.s32.totalorder %s803_s28, 0 }
  0x2d   : > { %p806_p1 = scmp.eq.s32.totalorder (!%p805_p13), %s667_s3, 0 }
  0x2e   : > { %189 = sbr.rel (%p805_p13) target bundleno = 683 (0x2ab), region = 36 }
  0x35   : > { %586 = dma.done.wait (%p806_p1), [#allocation4], 256   ;;  %p807_p0 = pmov %p806_p1 }
  0x36   : > { %p218_p5 = scmp.lt.s32.totalorder %s667_s3, 1  ;;  %v612_v0 = vmov 0.0   ;;  %vm613_vm0 = vmmov 0   ;;  %v507_v1 = vld [vmem:[#allocation3] sm:$0xff]   ;;  %v508_v2 = vld [vmem:[#allocation3 + $0x8] sm:$0xff]   ;;  %vm246_vm1 = vcmask 261120  }
  0x37   : > { %588 = vsyncadd (%p807_p0), [#allocation4], 4294967040  ;;  %440 = vmatprep.subr.bf16.mxu0 %v612_v0  ;;  %444 = vmatprep.mubr.msk.bf16.mxu0 %vm613_vm0, %v612_v0  ;;  %s290_s5 = sld [smem:[#allocation2]]  ;;  %v614_v14 = vmov 0   ;;  %s615_s6 = smov 64  }
  0x38   : > { %s731_s23 = scalar_select %p218_p5, %s667_s3, 1  ;;  %441 = vmatpush3.bf16.msra.mxu0 %v507_v1  ;;  %506 = vset.pattern.permute.xlu1 %v614_v14 }
  0x39   : > { %442 = vmatprep.subr.bf16.mxu0 %v612_v0  ;;  %505 = vset.pattern.permute.xlu0 %v614_v14  ;;  %s616_s10 = smov 96   ;;  %s215_s11 = sand.u32 1, %s599_s18  }
  0x3a   : > { %s427_s24 = sshll.u32 %s731_s23, 3  ;;  %s426_s12 = sshll.u32 %s215_s11, 3 }
  0x3b   : > { %s221_s30 = scalar_lea.vmem %s793_s0, %s427_s24  ;;  %s225_s9 = scalar_lea.vmem %s794_s1, %s427_s24 }
  0x3c   : > { %v227_v3 = vld [vmem:[%s221_s30] sm:$0xff]  ;;  %443 = vmatpush3.bf16.msra.mxu0 %v508_v2  ;;  %s434_s13 = sshll.u32 %s667_s3, 7  ;;  %s217_s14 = scalar_lea.vmem [#allocation6], %s426_s12 }
  0x3d   : > { %v228_v4 = vpack.c.bf16 %v227_v3, %v227_v3  ;;  %v291_v5 = vstv %s290_s5  ;;  %v229_v16 = vld [vmem:[%s225_s9] sm:$0xff]  ;;  %s337_s15 = sshll.u32 %s217_s14, 4  ;;  %s750_s23 = scalar_lea.hbm %s797_s4, %s434_s13  ;;  %s752_s15 = int_to_ptr.vmem [resolvable:$true] %s337_s15 }
  0x3e   : > { %s324_s24 = scalar_lea.sflag [#allocation5], %s215_s11  ;;  %s541_s28 = scalar_lea.vmem %s752_s15, 128 }
  0x3f   : > { %445 = vmatmul.mubr.msk.bf16.vlgmr.msra.gmra.mrb[0].mxu0 %vm246_vm1, %v228_v4  ;;  %p542_p6 = scmp.ne.s32.totalorder %s752_s15, %s541_s28  ;;  %p808_p9 = scmp.ne.s32.totalorder %s801_s26, 0 }
  0x40   : > { %s617_s3 = smov [#allocation6]  }
  0x41   : > { %p543_p10 = pnand %p542_p6, %p808_p9  ;;  %s545_s29 = sshll.u32 %s617_s3, 4  ;;  %s546_s29 = int_to_ptr.vmem [resolvable:$false] %s545_s29 }
  0x42   : > { %s547_s30 = scalar_lea.vmem %s546_s29, 256  ;;  %p548_p2 = scmp.lt.s32.totalorder %s752_s15, %s546_s29 }
  0x43   : > { %p544_p12 = pneg %p543_p10  ;;  %p549_p3 = scmp.lt.s32.totalorder %s547_s30, %s541_s28 }
  0x45   : > { %p550_p4 = por %p549_p3, %p548_p2 }
  0x47   : > { %p551_p7 = pnand %p550_p4, %p544_p12 }
 0x112   : > { %v284_v6 = vpop.f32.mrb[0].mxu0 }
 0x113   : > { %v292_v7 = vadd.f32 %v291_v5, %v284_v6  ;;  %v446_v8 = vpop.f32.mrb[1].mxu0 }
 0x114   : > { %v287_v9 = vpop.f32.mrb[2].mxu0 }
 0x115   : > { %v432_v10 = vmul.f32 -1.442695, %v292_v7  ;;  %v447_v11 = vpop.f32.mrb[3].mxu0 }
 0x117   : > { %509 = vpow2.f32 %v432_v10 }
 0x121   : > { %v510_v12 = vpop.eup %509 }
 0x122   : > { %v296_v13 = vadd.f32 1.0, %v510_v12 }
 0x124   : > { %511 = vrcp.f32 %v296_v13 }
 0x12e   : > { %v512_v15 = vpop.eup %511 }
 0x12f   : > { %300 = vrot.lane.b32.xlu0 %v512_v15, %s615_s6 }
 0x1a1   : > { %v301_v17 = vpop.permute.xlu0 %300 }
 0x1a2   : > { %v303_v18 = vmul.f32 %v301_v17, %v229_v16 }
 0x1a4   : > { %v304_v19 = vsub.f32 %v229_v16, %v303_v18  ;;  %307 = vperm.xlu1 %506, %v303_v18  }
 0x1a6   : > { %313 = vperm.xlu0 %505, %v304_v19  }
 0x223   : > { %v308_v22 = vpop.permute.xlu1 %307 }
 0x224   : > { %v310_v23 = vmul.f32 %v308_v22, %v284_v6 }
 0x225   : > { %v314_v20 = vpop.permute.xlu0 %313 }
 0x226   : > { %v316_v21 = vmul.f32 %v314_v20, %v284_v6 }
 0x228   : > { %318 = vrot.lane.b32.xlu1 %v316_v21, %s616_s10 }
 0x29a   : > { %v319_v24 = vpop.permute.xlu1 %318 }
 0x29b   : > { %v321_v25 = vadd.f32 %v319_v24, %v310_v23 }
 0x29d   : > { %322 = vst.msk [vmem:[%s217_s14] sm:$0xff] %vm246_vm1, %v321_v25 }
 0x29e   : > { %554 = shalt.err (!%p551_p7)
}
 0x29f   : > { %s555_s5 = scalar_lea.hbm %s750_s23, 128  ;;  %s559_s8 = scalar_lea.hbm %s797_s4, 256 }
 0x2a0   : > { %p556_p8 = scmp.ne.s32.totalorder %s750_s23, %s555_s5  ;;  %p560_p1 = scmp.lt.u32.totalorder %s750_s23, %s797_s4 }
 0x2a1   : > { %p561_p0 = scmp.lt.u32.totalorder %s559_s8, %s555_s5  ;;  %p563_p6 = scmp.lt.u32.totalorder %s555_s5, %s750_s23 }
 0x2a2   : > { %p557_p11 = pnand %p556_p8, %p808_p9 }
 0x2a3   : > { %p562_p5 = por %p561_p0, %p560_p1 }
 0x2a4   : > { %p558_p13 = pneg %p557_p11 }
 0x2a5   : > { %p564_p10 = por %p563_p6, %p562_p5 }
 0x2a7   : > { %p565_p12 = pnand %p564_p10, %p558_p13 }
 0x2a9   : > { %568 = shalt.err (!%p565_p12)
}
 0x2aa   : > { %452 = dma.vmem_to_hbm [thread:$0]  (%p808_p9), %s752_s15, 128, %s750_s23, %s324_s24  }
 0x2ab PF: > { %p464_p2 = scmp.ge.s32.totalorder %s607_s20, 2  ;;  %s349_s11 = sand.u32 1, %s595_s17  }
 0x2ac   : > { %p809_p3 = scmp.ne.s32.totalorder %s802_s27, 0  ;;  %s350_s12 = scalar_lea.sflag [#allocation5], %s349_s11 }
 0x2ae   : > { %p459_p4 = pnand %p464_p2, %p809_p3 }
 0x2b0   : > { %590 = dma.done.wait (!%p459_p4), %s350_s12, 128  }
 0x2b1   : > { %592 = vsyncadd (!%p459_p4), %s350_s12, 4294967168  ;;  %p16_p7 = scmp.ge.s32.totalorder %s671_s22, 4   ;;  %s810_s17 = smov %s599_s18 }
 0x2b2   : > { %s811_s18 = smov %s603_s19  ;;  %s812_s19 = smov %s682_s25 }
 0x2b3   : > { %s813_s20 = smov %s671_s22  ;;  %18 = sbr.rel (!%p16_p7) target bundleno = 6 (0x6), region = 79 }
 0x2ba   :  { %355 = vsyncpa [#allocation4], 1 }
 0x2bb   :  { %357 = vsyncpa [#allocation4 + $0x1], 1 }
 0x2bc   :  { %358 = vsyncpa [#allocation5], 1 }
 0x2bd   :  { %360 = vsyncpa [#allocation5 + $0x1], 1 }

</bundles_post_ra>
